<compile_context>
chip_gen: v6e
topology: v6e:2x2x1
jax: 0.10.0
libtpu: 0.0.40
codegen_flags: <defaults>
</compile_context>

<pallas_src>
import functools

import jax
import jax.numpy as jnp
from jax.experimental import pallas as pl
from jax.experimental.pallas import tpu as pltpu

IN_DIM = 28 * 28   # 784
HIDDEN = 128
OUT_DIM = 10
N_PAD = 128        # lane-dense padded logit width (wrapper slices [:, :10])


def _round_up(a, m):
    return (a + m - 1) // m * m


def _mlp_kernel(x_ref, w1_ref, b1_ref, w2_ref, b2_ref, out_ref):
    # x_ref:  (TM, 784)   f32  -> bf16 cast happens here (free on the VPU,
    #                             saves a full wrapper-side HBM pass over x)
    # w1_ref: (784, 128)  bf16     b1_ref: (1, 128) f32
    # w2_ref: (128, 128)  bf16 (N zero-padded 10 -> 128)
    # b2_ref: (1, 128)    f32 (zero-padded)
    # out_ref:(TM, 128)   f32 (padded; wrapper slices [:, :10])
    x = x_ref[...].astype(jnp.bfloat16)
    h = jnp.dot(x, w1_ref[...], preferred_element_type=jnp.float32)
    h = jnp.maximum(h + b1_ref[...], 0.0)          # bias-add + ReLU in f32
    h = h.astype(jnp.bfloat16)                      # back to bf16 for 2nd MXU pass
    o = jnp.dot(h, w2_ref[...], preferred_element_type=jnp.float32)
    out_ref[...] = (o + b2_ref[...]).astype(out_ref.dtype)


def prepare_params(w1, b1, w2, b2):
    """Call-once param prep (hoisted out of the forward):
    bf16 weights, (1,128) f32 biases, second layer zero-padded 10 -> 128."""
    w1_bf = w1.astype(jnp.bfloat16)
    w2_bf = jnp.zeros((HIDDEN, N_PAD), jnp.bfloat16).at[:, :OUT_DIM].set(
        w2.astype(jnp.bfloat16))
    b1_2d = b1.reshape(1, HIDDEN).astype(jnp.float32)
    b2_2d = jnp.zeros((1, N_PAD), jnp.float32).at[0, :OUT_DIM].set(
        b2.astype(jnp.float32))
    return w1_bf, b1_2d, w2_bf, b2_2d


def _choose_tm(batch, tm_max):
    tm = min(tm_max, _round_up(batch, 8))
    # v7x megacore: once the batch is large enough, guarantee >= 2 grid steps
    # so dimension_semantics=("parallel",) has work for both TensorCores.
    # (No effect on single-TC v5e/v6e; tiny batches keep a single step.)
    if batch >= 512 and pl.cdiv(batch, tm) < 2:
        tm = _round_up(pl.cdiv(batch, 2), 8)
    return tm


@functools.partial(jax.jit, static_argnames=("tm_max",))
def mlp_forward(x_nchw, params, *, tm_max=2048):
    """x_nchw: (B, 1, 28, 28) float32 -> logits (B, 10) float32."""
    w1_bf, b1_2d, w2_bf, b2_2d = params
    batch = x_nchw.shape[0]
    x_flat = x_nchw.reshape(batch, IN_DIM).astype(jnp.float32)  # nn.Flatten

    tm = _choose_tm(batch, tm_max)
    grid = (pl.cdiv(batch, tm),)   # ragged last block: OOB rows masked on store

    flops = 2 * batch * (IN_DIM * HIDDEN + HIDDEN * N_PAD)
    bytes_accessed = (
        batch * IN_DIM * 4          # x (f32, single pass; cast in-kernel)
        + IN_DIM * HIDDEN * 2       # w1 (bf16, resident)
        + HIDDEN * N_PAD * 2        # w2 (bf16, resident)
        + (HIDDEN + N_PAD) * 4      # biases (f32)
        + batch * N_PAD * 4         # out (f32)
    )

    out_padded = pl.pallas_call(
        _mlp_kernel,
        out_shape=jax.ShapeDtypeStruct((batch, N_PAD), jnp.float32),
        grid_spec=pltpu.PrefetchScalarGridSpec(
            num_scalar_prefetch=0,
            grid=grid,
            in_specs=[
                pl.BlockSpec((tm, IN_DIM), lambda i: (i, 0)),      # x tile moves
                pl.BlockSpec((IN_DIM, HIDDEN), lambda i: (0, 0)),  # w1 resident
                pl.BlockSpec((1, HIDDEN), lambda i: (0, 0)),       # b1 resident
                pl.BlockSpec((HIDDEN, N_PAD), lambda i: (0, 0)),   # w2 resident
                pl.BlockSpec((1, N_PAD), lambda i: (0, 0)),        # b2 resident
            ],
            out_specs=pl.BlockSpec((tm, N_PAD), lambda i: (i, 0)),
        ),
        compiler_params=pltpu.CompilerParams(
            dimension_semantics=("parallel",),   # megacore sharding on v7x
            vmem_limit_bytes=32 * 1024 * 1024,
        ),
        cost_estimate=pl.CostEstimate(
            flops=flops, transcendentals=0, bytes_accessed=bytes_accessed),
    )(x_flat, w1_bf, b1_2d, w2_bf, b2_2d)

    return out_padded[:, :OUT_DIM]   # fuses into the jit; padded lanes dropped


def init_params(key):
    """Deterministic init matching PyTorch nn.Linear default:
    U(-1/sqrt(fan_in), 1/sqrt(fan_in)) for both weights and biases."""
    k1, k2, k3, k4 = jax.random.split(key, 4)
    bound1 = 1.0 / jnp.sqrt(IN_DIM)
    bound2 = 1.0 / jnp.sqrt(HIDDEN)
    # Stored as (in, out) so the kernel does x @ W (== PyTorch's x @ W.T).
    w1 = jax.random.uniform(k1, (IN_DIM, HIDDEN), jnp.float32, -bound1, bound1)
    b1 = jax.random.uniform(k2, (HIDDEN,), jnp.float32, -bound1, bound1)
    w2 = jax.random.uniform(k3, (HIDDEN, OUT_DIM), jnp.float32, -bound2, bound2)
    b2 = jax.random.uniform(k4, (OUT_DIM,), jnp.float32, -bound2, bound2)
    return w1, b1, w2, b2


if __name__ == "__main__":
    key = jax.random.PRNGKey(0)
    kx, kp = jax.random.split(key)

    B = 8
    x = jax.random.normal(kx, (B, 1, 28, 28), jnp.float32)  # NCHW, like MNIST
    w1, b1, w2, b2 = init_params(kp)
    params = prepare_params(w1, b1, w2, b2)

    out = mlp_forward(x, params)
    out = jax.block_until_ready(out)
    assert out.shape == (B, 10)

    # Reference with the same bf16-cast matmul operands, f32 math on host.
    x_flat = x.reshape(B, -1).astype(jnp.bfloat16).astype(jnp.float32)
    w1_r = w1.astype(jnp.bfloat16).astype(jnp.float32)
    w2_r = w2.astype(jnp.bfloat16).astype(jnp.float32)
    h_r = jnp.maximum(x_flat @ w1_r + b1, 0.0)
    h_r = h_r.astype(jnp.bfloat16).astype(jnp.float32)
    ref = h_r @ w2_r + b2
    assert jnp.allclose(out, ref, atol=2e-3, rtol=2e-3), (
        float(jnp.max(jnp.abs(out - ref))))

    # Loose sanity check vs the pure-f32 PyTorch-equivalent forward.
    ref_f32 = jnp.maximum(x.reshape(B, -1) @ w1 + b1, 0.0) @ w2 + b2
    assert jnp.allclose(out, ref_f32, atol=5e-2, rtol=5e-2)

    print("KERNEL_OK")
</pallas_src>

<mosaic_0001>
module attributes {stable_mosaic.version = 11 : i64} {
  func.func @_mlp_kernel(%arg0: i32, %arg1: memref<8x784xf32, #tpu.memory_space<vmem>>, %arg2: memref<784x128xbf16, #tpu.memory_space<vmem>>, %arg3: memref<1x128xf32, #tpu.memory_space<vmem>>, %arg4: memref<128x128xbf16, #tpu.memory_space<vmem>>, %arg5: memref<1x128xf32, #tpu.memory_space<vmem>>, %arg6: memref<8x128xf32, #tpu.memory_space<vmem>>) attributes {dimension_semantics = [#tpu.dimension_semantics<parallel>], iteration_bounds = array<i64: 1>, scalar_prefetch = 0 : i64, scratch_operands = 0 : i64, tpu.core_type = #tpu.core_type<tc>, window_params = [{transform_indices = @transform_0, window_bounds = array<i64: 8, 784>}, {pipeline_mode = #tpu.pipeline_mode<synchronous>, transform_indices = @transform_1, window_bounds = array<i64: 784, 128>}, {pipeline_mode = #tpu.pipeline_mode<synchronous>, transform_indices = @transform_2, window_bounds = array<i64: 1, 128>}, {pipeline_mode = #tpu.pipeline_mode<synchronous>, transform_indices = @transform_3, window_bounds = array<i64: 128, 128>}, {pipeline_mode = #tpu.pipeline_mode<synchronous>, transform_indices = @transform_4, window_bounds = array<i64: 1, 128>}, {transform_indices = @transform_5, window_bounds = array<i64: 8, 128>}]} {
    %c0 = arith.constant 0 : index
    %c0_0 = arith.constant 0 : index
    %0 = vector.load %arg1[%c0, %c0_0] : memref<8x784xf32, #tpu.memory_space<vmem>>, vector<8x784xf32>
    %1 = arith.truncf %0 : vector<8x784xf32> to vector<8x784xbf16>
    %c0_1 = arith.constant 0 : index
    %c0_2 = arith.constant 0 : index
    %2 = vector.load %arg2[%c0_1, %c0_2] : memref<784x128xbf16, #tpu.memory_space<vmem>>, vector<784x128xbf16>
    %cst = arith.constant dense<0.000000e+00> : vector<8x128xf32>
    %3 = tpu.matmul %1, %2, %cst {dimension_numbers = #tpu.dot_dimension_numbers<[1], [0], [0], [1], [0, 0, 1, 1], [], []>} : vector<8x784xbf16>, vector<784x128xbf16>, vector<8x128xf32> -> vector<8x128xf32>
    %c0_3 = arith.constant 0 : index
    %c0_4 = arith.constant 0 : index
    %4 = vector.load %arg3[%c0_3, %c0_4] : memref<1x128xf32, #tpu.memory_space<vmem>>, vector<1x128xf32>
    %5 = vector.broadcast %4 : vector<1x128xf32> to vector<8x128xf32>
    %6 = arith.addf %3, %5 : vector<8x128xf32>
    %cst_5 = arith.constant 0.000000e+00 : f32
    %7 = vector.broadcast %cst_5 : f32 to vector<8x128xf32>
    %8 = arith.maximumf %6, %7 : vector<8x128xf32>
    %9 = arith.truncf %8 : vector<8x128xf32> to vector<8x128xbf16>
    %c0_6 = arith.constant 0 : index
    %c0_7 = arith.constant 0 : index
    %10 = vector.load %arg4[%c0_6, %c0_7] : memref<128x128xbf16, #tpu.memory_space<vmem>>, vector<128x128xbf16>
    %cst_8 = arith.constant dense<0.000000e+00> : vector<8x128xf32>
    %11 = tpu.matmul %9, %10, %cst_8 {dimension_numbers = #tpu.dot_dimension_numbers<[1], [0], [0], [1], [0, 0, 1, 1], [], []>} : vector<8x128xbf16>, vector<128x128xbf16>, vector<8x128xf32> -> vector<8x128xf32>
    %c0_9 = arith.constant 0 : index
    %c0_10 = arith.constant 0 : index
    %12 = vector.load %arg5[%c0_9, %c0_10] : memref<1x128xf32, #tpu.memory_space<vmem>>, vector<1x128xf32>
    %13 = vector.broadcast %12 : vector<1x128xf32> to vector<8x128xf32>
    %14 = arith.addf %11, %13 : vector<8x128xf32>
    %c0_11 = arith.constant 0 : index
    %c0_12 = arith.constant 0 : index
    %15 = vector.load %arg6[%c0_11, %c0_12] : memref<8x128xf32, #tpu.memory_space<vmem>>, vector<8x128xf32>
    tpu.vector_store %arg6[%c0_11, %c0_12], %14 {strides = array<i32>} : memref<8x128xf32, #tpu.memory_space<vmem>>, vector<8x128xf32>,
    return
  }
  func.func @transform_0(%arg0: i32) -> (i32, i32) {
    %c0_i32 = arith.constant 0 : i32
    %c0_i32_0 = arith.constant 0 : i32
    return %arg0, %c0_i32 : i32, i32
  }
  func.func @transform_1(%arg0: i32) -> (i32, i32) {
    %c0_i32 = arith.constant 0 : i32
    %c0_i32_0 = arith.constant 0 : i32
    %c0_i32_1 = arith.constant 0 : i32
    return %c0_i32, %c0_i32_0 : i32, i32
  }
  func.func @transform_2(%arg0: i32) -> (i32, i32) {
    %c0_i32 = arith.constant 0 : i32
    %c0_i32_0 = arith.constant 0 : i32
    %c0_i32_1 = arith.constant 0 : i32
    return %c0_i32, %c0_i32_0 : i32, i32
  }
  func.func @transform_3(%arg0: i32) -> (i32, i32) {
    %c0_i32 = arith.constant 0 : i32
    %c0_i32_0 = arith.constant 0 : i32
    %c0_i32_1 = arith.constant 0 : i32
    return %c0_i32, %c0_i32_0 : i32, i32
  }
  func.func @transform_4(%arg0: i32) -> (i32, i32) {
    %c0_i32 = arith.constant 0 : i32
    %c0_i32_0 = arith.constant 0 : i32
    %c0_i32_1 = arith.constant 0 : i32
    return %c0_i32, %c0_i32_0 : i32, i32
  }
  func.func @transform_5(%arg0: i32) -> (i32, i32) {
    %c0_i32 = arith.constant 0 : i32
    %c0_i32_0 = arith.constant 0 : i32
    return %arg0, %c0_i32 : i32, i32
  }
}

</mosaic_0001>

<bundles_post_ra>
// kernel: mlp_forward.1
= control target key start
LH: loop header
LB: loop body
LE: loop exit
PB: predicated region body
PF: predicated region fallthrough
CT: control target
= control target key end

     0   :  { %v972_v44 = vmov 0.0   ;;  %vm973_vm0 = vmmov 0   ;;  %vm435_vm1 = vcmask 130048   ;;  %s1219_s0 = inlined_call_operand.vmem [shape: f32[8,784], index: 0, kind: input, shape index: {}]   ;;  %s1220_s1 = inlined_call_operand.vmem [shape: bf16[784,128], index: 1, kind: input, shape index: {}]   ;;  %s1221_s2 = inlined_call_operand.vmem [shape: f32[1,128], index: 2, kind: input, shape index: {}]   ;;  %s1222_s3 = inlined_call_operand.vmem [shape: bf16[128,128], index: 3, kind: input, shape index: {}]   ;;  %s1223_s4 = inlined_call_operand.vmem [shape: f32[1,128], index: 4, kind: input, shape index: {}]   ;;  %s1224_s5 = inlined_call_operand.hbm [shape: f32[8,128], index: 5, kind: output, shape index: {}]  }
   0x1   :  { %v893_v0 = vld [vmem:[%s1220_s1 + $0x78] sm:$0xff]   ;;  %v897_v4 = vld [vmem:[%s1220_s1 + $0x70] sm:$0xff]   ;;  %v901_v8 = vld [vmem:[%s1220_s1 + $0x68] sm:$0xff]  }
   0x2   :  { %v894_v1 = vld [vmem:[%s1220_s1 + $0x38] sm:$0xff]   ;;  %787 = vmatprep.subr.bf16.mxu0 %v893_v0  ;;  %v898_v5 = vld [vmem:[%s1220_s1 + $0x30] sm:$0xff]   ;;  %v902_v9 = vld [vmem:[%s1220_s1 + $0x28] sm:$0xff]  }
   0x3   :  { %v895_v2 = vld [vmem:[%s1220_s1 + $0xf8] sm:$0xff]   ;;  %788 = vmatpush3.bf16.msra.mxu0 %v894_v1  ;;  %v899_v6 = vld [vmem:[%s1220_s1 + $0xf0] sm:$0xff]   ;;  %v903_v10 = vld [vmem:[%s1220_s1 + $0xe8] sm:$0xff]  }
   0x4   :  { %v896_v3 = vld [vmem:[%s1220_s1 + $0xb8] sm:$0xff]   ;;  %809 = vmatprep.subr.bf16.mxu1 %v895_v2  ;;  %789 = vmatprep.subr.bf16.mxu0 %v897_v4  ;;  %v900_v7 = vld [vmem:[%s1220_s1 + $0xb0] sm:$0xff]   ;;  %v904_v11 = vld [vmem:[%s1220_s1 + $0xa8] sm:$0xff]  }
   0x5   :  { %810 = vmatpush3.bf16.msra.mxu1 %v896_v3  ;;  %v905_v12 = vld [vmem:[%s1220_s1 + $0x60] sm:$0xff]   ;;  %v909_v16 = vld [vmem:[%s1220_s1 + $0x58] sm:$0xff]   ;;  %v913_v20 = vld [vmem:[%s1220_s1 + $0x50] sm:$0xff]  }
   0x6   :  { %811 = vmatprep.subr.bf16.mxu1 %v899_v6  ;;  %v906_v13 = vld [vmem:[%s1220_s1 + $0x20] sm:$0xff]   ;;  %v910_v17 = vld [vmem:[%s1220_s1 + $0x18] sm:$0xff]   ;;  %v914_v21 = vld [vmem:[%s1220_s1 + $0x10] sm:$0xff]  }
   0x7   :  { %790 = vmatpush3.bf16.msra.mxu0 %v898_v5  ;;  %v907_v14 = vld [vmem:[%s1220_s1 + $0xe0] sm:$0xff]   ;;  %v911_v18 = vld [vmem:[%s1220_s1 + $0xd8] sm:$0xff]   ;;  %v915_v22 = vld [vmem:[%s1220_s1 + $0xd0] sm:$0xff]  }
   0x8   :  { %791 = vmatprep.subr.bf16.mxu0 %v901_v8  ;;  %v908_v15 = vld [vmem:[%s1220_s1 + $0xa0] sm:$0xff]   ;;  %v912_v19 = vld [vmem:[%s1220_s1 + $0x98] sm:$0xff]   ;;  %v916_v23 = vld [vmem:[%s1220_s1 + $0x90] sm:$0xff]  }
   0x9   :  { %812 = vmatpush3.bf16.msra.mxu1 %v900_v7  ;;  %v917_v24 = vld [vmem:[%s1220_s1 + $0x48] sm:$0xff]   ;;  %v921_v28 = vld [vmem:[%s1220_s1 + $0x40] sm:$0xff]   ;;  %v925_v36 = vld [vmem:[%s1220_s1 + $0x178] sm:$0xff]  }
   0xa   :  { %813 = vmatprep.subr.bf16.mxu1 %v903_v10  ;;  %v918_v25 = vld [vmem:[%s1220_s1 + $0x8] sm:$0xff]   ;;  %v922_v29 = vld [vmem:[%s1220_s1] sm:$0xff]   ;;  %v25_v37 = vld [vmem:[%s1219_s0 + $0x18] sm:$0xff] }
   0xb   :  { %792 = vmatpush3.bf16.msra.mxu0 %v902_v9  ;;  %v919_v26 = vld [vmem:[%s1220_s1 + $0xc8] sm:$0xff]   ;;  %v923_v30 = vld [vmem:[%s1220_s1 + $0xc0] sm:$0xff]   ;;  %v32_v38 = vpack.c.bf16 %v25_v37, %v25_v37  ;;  %v926_v39 = vld [vmem:[%s1220_s1 + $0x138] sm:$0xff]  }
   0xc   :  { %793 = vmatprep.subr.bf16.mxu0 %v905_v12  ;;  %v920_v27 = vld [vmem:[%s1220_s1 + $0x88] sm:$0xff]   ;;  %v924_v33 = vld [vmem:[%s1220_s1 + $0x80] sm:$0xff]   ;;  %v24_v40 = vld [vmem:[%s1219_s0 + $0x10] sm:$0xff] }
   0xd   :  { %814 = vmatpush3.bf16.msra.mxu1 %v904_v11  ;;  %v23_v31 = vld [vmem:[%s1219_s0 + $0x8] sm:$0xff]  ;;  %v22_v34 = vld [vmem:[%s1219_s0] sm:$0xff]  ;;  %511 = vmatprep.mubr.bf16.mxu1 %v32_v38  ;;  %v31_v41 = vpack.c.bf16 %v24_v40, %v24_v40  ;;  %v927_v42 = vld [vmem:[%s1220_s1 + $0x170] sm:$0xff]  }
   0xe   :  { %815 = vmatprep.subr.bf16.mxu1 %v907_v14  ;;  %v30_v32 = vpack.c.bf16 %v23_v31, %v23_v31  ;;  %v29_v35 = vpack.c.bf16 %v22_v34, %v22_v34  ;;  %v928_v43 = vld [vmem:[%s1220_s1 + $0x130] sm:$0xff]   ;;  %v929_v45 = vld [vmem:[%s1220_s1 + $0x168] sm:$0xff]   ;;  %v931_v47 = vld [vmem:[%s1220_s1 + $0x160] sm:$0xff]  }
   0xf   :  { %794 = vmatpush3.bf16.msra.mxu0 %v906_v13  ;;  %v930_v46 = vld [vmem:[%s1220_s1 + $0x128] sm:$0xff]   ;;  %v932_v48 = vld [vmem:[%s1220_s1 + $0x120] sm:$0xff]   ;;  %v933_v49 = vld [vmem:[%s1220_s1 + $0x158] sm:$0xff]  }
  0x10   :  { %795 = vmatprep.subr.bf16.mxu0 %v909_v16  ;;  %471 = vmatprep.mubr.bf16.mxu0 %v30_v32  ;;  %v934_v50 = vld [vmem:[%s1220_s1 + $0x118] sm:$0xff]   ;;  %v935_v51 = vld [vmem:[%s1220_s1 + $0x150] sm:$0xff]   ;;  %v941_v53 = vld [vmem:[%s1220_s1 + $0x180] sm:$0xff]  }
  0x11   :  { %816 = vmatpush3.bf16.msra.mxu1 %v908_v15  ;;  %v936_v52 = vld [vmem:[%s1220_s1 + $0x110] sm:$0xff]   ;;  %v27_v54 = vld [vmem:[%s1219_s0 + $0x28] sm:$0xff] }
  0x12   :  { %817 = vmatprep.subr.bf16.mxu1 %v911_v18  ;;  %v937_v55 = vld [vmem:[%s1220_s1 + $0x148] sm:$0xff]   ;;  %v34_v56 = vpack.c.bf16 %v27_v54, %v27_v54  ;;  %v28_v57 = vld [vmem:[%s1219_s0 + $0x30] sm:$0xff] }
  0x13   :  { %796 = vmatpush3.bf16.msra.mxu0 %v910_v17  ;;  %v35_v58 = vpack.c.bf16 %v28_v57, %v28_v57  ;;  %v938_v59 = vld [vmem:[%s1220_s1 + $0x108] sm:$0xff]  }
  0x14   :  { %797 = vmatprep.subr.bf16.mxu0 %v913_v20 }
  0x15   :  { %818 = vmatpush3.bf16.msra.mxu1 %v912_v19 }
  0x16   :  { %819 = vmatprep.subr.bf16.mxu1 %v915_v22 }
  0x17   :  { %798 = vmatpush3.bf16.msra.mxu0 %v914_v21 }
  0x18   :  { %799 = vmatprep.subr.bf16.mxu0 %v917_v24 }
  0x19   :  { %820 = vmatpush3.bf16.msra.mxu1 %v916_v23 }
  0x1a   :  { %821 = vmatprep.subr.bf16.mxu1 %v919_v26 }
  0x1b   :  { %800 = vmatpush3.bf16.msra.mxu0 %v918_v25 }
  0x1c   :  { %801 = vmatprep.subr.bf16.mxu0 %v921_v28 }
  0x1d   :  { %822 = vmatpush3.bf16.msra.mxu1 %v920_v27 }
  0x1e   :  { %823 = vmatprep.subr.bf16.mxu1 %v923_v30 }
  0x1f   :  { %802 = vmatpush3.bf16.msra.mxu0 %v922_v29 }
  0x20   :  { %831 = vmatprep.subr.bf16.mxu0 %v925_v36 }
  0x21   :  { %824 = vmatpush3.bf16.msra.mxu1 %v924_v33 }
  0x22   :  { %472 = vmatmul.mubr.bf16.vlgmr.msra.gmra.mxu0 %v29_v35  ;;  %864 = vmatprep.subr.bf16.mxu1 %v972_v44 }
  0x23   :  { %832 = vmatpush3.bf16.msra.mxu0 %v926_v39  ;;  %551 = vmatprep.mubr.bf16.mxu0 %v34_v56 }
  0x24   :  { %512 = vmatmul.mubr.bf16.vlgmr.msra.gmra.mxu1 %v31_v41  ;;  %833 = vmatprep.subr.bf16.mxu0 %v927_v42 }
  0x25   :  { %866 = vmatprep.mubr.msk.bf16.mxu1 %vm973_vm0, %v972_v44  ;;  %865 = vmatpush3.bf16.msra.mxu1 %v941_v53 }
  0x26   :  { %870 = vmatprep.subr.bf16.mxu1 %v972_v44 }
  0x27   :  { %834 = vmatpush3.bf16.msra.mxu0 %v928_v43 }
  0x28   :  { %835 = vmatprep.subr.bf16.mxu0 %v929_v45 }
  0x2b   :  { %836 = vmatpush3.bf16.msra.mxu0 %v930_v46 }
  0x2c   :  { %837 = vmatprep.subr.bf16.mxu0 %v931_v47  ;;  %867 = vmatmul.mubr.msk.bf16.vlgmr.msra.gmra.mxu1 %vm435_vm1, %v35_v58 }
  0x2d   :  { %886 = vmatprep.mubr.msk.bf16.mxu1 %vm973_vm0, %v972_v44 }
  0x2f   :  { %838 = vmatpush3.bf16.msra.mxu0 %v932_v48 }
  0x30   :  { %839 = vmatprep.subr.bf16.mxu0 %v933_v49 }
  0x33   :  { %840 = vmatpush3.bf16.msra.mxu0 %v934_v50 }
  0x34   :  { %841 = vmatprep.subr.bf16.mxu0 %v935_v51 }
  0x37   :  { %842 = vmatpush3.bf16.msra.mxu0 %v936_v52 }
  0x38   :  { %10 = vsyncpa [#allocation3], 0  ;;  %843 = vmatprep.subr.bf16.mxu0 %v937_v55  ;;  %v939_v60 = vld [vmem:[%s1220_s1 + $0x140] sm:$0xff]   ;;  %v942_v0 = vld [vmem:[%s1222_s3 + $0x38] sm:$0xff]   ;;  %s974_s22 = smov [#allocation2]  }
  0x39   :  { %v940_v61 = vld [vmem:[%s1220_s1 + $0x100] sm:$0xff]   ;;  %871 = vmatpush3.bf16.msra.mxu1 %v942_v0  ;;  %v943_v1 = vld [vmem:[%s1222_s3 + $0x30] sm:$0xff]   ;;  %v944_v2 = vld [vmem:[%s1222_s3 + $0x28] sm:$0xff]   ;;  %s719_s23 = sshll.u32 %s974_s22, 4  ;;  %s720_s23 = int_to_ptr.vmem [resolvable:$true] %s719_s23 }
  0x3a   :  { %v26_v62 = vld [vmem:[%s1219_s0 + $0x20] sm:$0xff]  ;;  %872 = vmatprep.subr.bf16.mxu1 %v972_v44  ;;  %v946_v4 = vld [vmem:[%s1222_s3 + $0x18] sm:$0xff]   ;;  %v947_v5 = vld [vmem:[%s1222_s3 + $0x10] sm:$0xff]   ;;  %p955_p1 = scmp.lt.s32.totalorder %s720_s23, %s720_s23 }
  0x3b   :  { %844 = vmatpush3.bf16.msra.mxu0 %v938_v59  ;;  %v33_v63 = vpack.c.bf16 %v26_v62, %v26_v62  ;;  %v945_v3 = vld [vmem:[%s1222_s3 + $0x20] sm:$0xff]   ;;  %v948_v6 = vld [vmem:[%s1222_s3 + $0x8] sm:$0xff]  }
  0x3c   :  { %845 = vmatprep.subr.bf16.mxu0 %v939_v60  ;;  %v949_v7 = vld [vmem:[%s1222_s3] sm:$0xff]  }
  0x3d   :  { %873 = vmatpush3.bf16.msra.mxu1 %v943_v1  ;;  %v727_v21 = vld [vmem:[%s1221_s2] ss:$0 sm:$0xff]  ;;  %s950_s2 = scalar_lea.vmem %s720_s23, 128 }
  0x3e   :  { %874 = vmatprep.subr.bf16.mxu1 %v972_v44  ;;  %v778_v34 = vld [vmem:[%s1223_s4] ss:$0 sm:$0xff]  ;;  %p951_p0 = scmp.ne.s32.totalorder %s720_s23, %s950_s2  ;;  %p956_p2 = scmp.lt.s32.totalorder %s950_s2, %s950_s2 }
  0x3f   :  { %846 = vmatpush3.bf16.msra.mxu0 %v940_v61 }
  0x40   :  { %p957_p3 = por %p956_p2, %p955_p1 }
  0x41   :  { %875 = vmatpush3.bf16.msra.mxu1 %v944_v2 }
  0x42   :  { %552 = vmatmul.mubr.bf16.vlgmr.msra.gmra.mxu0 %v33_v63  ;;  %876 = vmatprep.subr.bf16.mxu1 %v972_v44  ;;  %p958_p4 = pnand %p957_p3, %p951_p0 }
  0x45   :  { %877 = vmatpush3.bf16.msra.mxu1 %v945_v3 }
  0x46   :  { %878 = vmatprep.subr.bf16.mxu1 %v972_v44 }
  0x49   :  { %879 = vmatpush3.bf16.msra.mxu1 %v946_v4 }
  0x4a   :  { %880 = vmatprep.subr.bf16.mxu1 %v972_v44 }
  0x4d   :  { %881 = vmatpush3.bf16.msra.mxu1 %v947_v5 }
  0x4e   :  { %882 = vmatprep.subr.bf16.mxu1 %v972_v44 }
  0x51   :  { %883 = vmatpush3.bf16.msra.mxu1 %v948_v6 }
  0x52   :  { %884 = vmatprep.subr.bf16.mxu1 %v972_v44 }
  0x55   :  { %885 = vmatpush3.bf16.msra.mxu1 %v949_v7 }
  0xe2   :  { %v803_v8 = vpop.f32.mrf.mxu0 }
  0xe4   :  { %v804_v9 = vpop.f32.mrf.mxu0  ;;  %v825_v10 = vpop.f32.mrf.mxu1 }
  0xe5   :  { %v805_v20 = vadd.f32 %v804_v9, %v803_v8 }
  0xe6   :  { %v806_v11 = vpop.f32.mrf.mxu0  ;;  %v826_v12 = vpop.f32.mrf.mxu1 }
  0xe7   :  { %v474_v22 = vadd.f32 %v805_v20, %v727_v21  ;;  %v827_v23 = vadd.f32 %v826_v12, %v825_v10 }
  0xe8   :  { %v807_v13 = vpop.f32.mrf.mxu0  ;;  %v828_v14 = vpop.f32.mrf.mxu1 }
  0xe9   :  { %v514_v26 = vadd.f32 %v827_v23, %v474_v22 }
  0xea   :  { %v829_v15 = vpop.f32.mrf.mxu1 }
  0xec   :  { %v593_v16 = vpop.f32.mrf.mxu1 }
  0xee   :  { %v868_v17 = vpop.f32.mrf.mxu1 }
  0xf0   :  { %v596_v18 = vpop.f32.mrf.mxu1 }
  0xf2   :  { %v869_v19 = vpop.f32.mrf.mxu1 }
 0x102   :  { %v847_v24 = vpop.f32.mrf.mxu0 }
 0x104   :  { %v848_v25 = vpop.f32.mrf.mxu0 }
 0x105   :  { %v849_v27 = vadd.f32 %v848_v25, %v847_v24 }
 0x106   :  { %v850_v28 = vpop.f32.mrf.mxu0 }
 0x107   :  { %v554_v29 = vadd.f32 %v849_v27, %v514_v26 }
 0x108   :  { %v851_v30 = vpop.f32.mrf.mxu0 }
 0x109   :  { %v594_v31 = vadd.f32 %v593_v16, %v554_v29 }
 0x10b   :  { %v599_v32 = vmax.f32 %v594_v31, 0.0 }
 0x10d   :  { %v600_v33 = vpack.c.bf16 %v599_v32, %v599_v32 }
 0x10f   :  { %887 = vmatmul.mubr.bf16.vlgmr.msra.gmra.mxu1 %v600_v33 }
 0x1cf   :  { %v706_v35 = vpop.f32.mrf.mxu1 }
 0x1d0   :  { %v707_v36 = vadd.f32 %v778_v34, %v706_v35 }
 0x1d1   :  { %v888_v37 = vpop.f32.mrf.mxu1 }
 0x1d2   :  { %712 = vst [vmem:[#allocation2] sm:$0xff] %v707_v36 }
 0x1d3   :  { %v709_v38 = vpop.f32.mrf.mxu1 }
 0x1d4   :  { %961 = shalt.err (!%p958_p4)
}
 0x1d5   :  { %722 = dma.vmem_to_hbm [thread:$0]  %s720_s23, 128, %s1224_s5, [#allocation3]   ;;  %v889_v39 = vpop.f32.mrf.mxu1 }
 0x1d6   :  { %970 = dma.done.wait [#allocation3], 128  }
 0x1d7   :  { %971 = vsyncadd [#allocation3], 4294967168 }
 0x1d8   :  { %726 = vsyncpa [#allocation3], 1 }

</bundles_post_ra>
